<compile_context>
chip_gen: v6e
topology: v6e:2x2x1
jax: 0.10.0
libtpu: 0.0.40
codegen_flags: <defaults>
</compile_context>

<pallas_src>
import numpy as np
import jax
import jax.numpy as jnp
from jax.experimental import pallas as pl
from jax.experimental.pallas import tpu as pltpu

BN_EPS = 1e-5
_VMEM_LIMIT_BYTES = 32 * 1024 * 1024  # far above what this kernel uses


# ----------------------------------------------------------------------------- helpers
def _bilinear_matrix(out_size: int, in_size: int) -> np.ndarray:
    """1-D interpolation operator matching F.interpolate(mode='bilinear',
    align_corners=False) along one spatial axis."""
    A = np.zeros((out_size, in_size), dtype=np.float32)
    if in_size == 1:
        A[:, 0] = 1.0
        return A
    scale = in_size / out_size
    for i in range(out_size):
        src = max((i + 0.5) * scale - 0.5, 0.0)
        p0 = min(int(np.floor(src)), in_size - 1)
        p1 = min(p0 + 1, in_size - 1)
        w = src - p0
        A[i, p0] += 1.0 - w
        A[i, p1] += w
    return A


def _avgpool_matrix(in_size: int, ds: int) -> np.ndarray:
    """1-D average-pool operator (kernel == stride == ds)."""
    out_size = in_size // ds
    P = np.zeros((out_size, in_size), dtype=np.float32)
    for p in range(out_size):
        P[p, p * ds:(p + 1) * ds] = 1.0 / ds
    return P


# ----------------------------------------------------------------------------- kernel
def _psp_fused_kernel(x_ref, pt_ref, wblk_ref, gb_ref, ut_ref, out_ref):
    """Fused AvgPool + 1x1 Conv + BatchNorm(train) + ReLU + bilinear Upsample.

    x_ref   : [N*Cin,  S ]       input, spatial flattened (NCHW, free reshape)
    pt_ref  : [S, Sd]            combined separable pool operator, transposed
    wblk_ref: [N*Cout, N*Cin]    kron(I_N, conv_w) -> block-diagonal 1x1 conv
    gb_ref  : [Cout, 2]          column 0 = gamma, column 1 = beta
    ut_ref  : [Sd, Su]           combined separable upsample operator, transposed
    out_ref : [N*Cout, Su]       lane-dense output (Su >= 128)
    """
    cout = gb_ref.shape[0]
    n = out_ref.shape[0] // cout
    sd = pt_ref.shape[1]

    # AvgPool (K = H*W contraction) and 1x1 conv, batched over N via block-diag W.
    pooled = jnp.dot(x_ref[...], pt_ref[...], preferred_element_type=jnp.float32)   # [N*Cin, Sd]
    y = jnp.dot(wblk_ref[...], pooled, preferred_element_type=jnp.float32)          # [N*Cout, Sd]

    # BatchNorm2d, training-mode batch statistics, computed once (two-pass mean/var).
    y3 = y.reshape(n, cout, sd)                                                      # value reshape
    inv_count = 1.0 / float(n * sd)
    mean = jnp.sum(jnp.sum(y3, axis=2, keepdims=True), axis=0) * inv_count           # [Cout, 1]
    d = y3 - mean[None]                                                              # [N, Cout, Sd]
    var = jnp.sum(jnp.sum(d * d, axis=2, keepdims=True), axis=0) * inv_count         # [Cout, 1]

    gamma = gb_ref[:, 0:1]                                                           # [Cout, 1]
    beta = gb_ref[:, 1:2]                                                            # [Cout, 1]
    scale = gamma * jax.lax.rsqrt(var + BN_EPS)                                      # folded scale

    # Normalize + affine + ReLU, then the bilinear upsample as one lane-dense matmul.
    z = jnp.maximum(d * scale[None] + beta[None], 0.0).reshape(n * cout, sd)         # [N*Cout, Sd]
    out_ref[...] = jnp.dot(z, ut_ref[...], preferred_element_type=jnp.float32)       # [N*Cout, Su]


# ----------------------------------------------------------------------------- wrapper
def psp_decoder_forward(x_nchw, conv_w, gamma, beta, downsize, upsize):
    """Pallas implementation of PSPDecoder.forward. x_nchw: [N, Cin, H, W] -> NCHW out."""
    N, Cin, H, W = x_nchw.shape
    Cout = conv_w.shape[0]
    Hd, Wd = H // downsize, W // downsize
    Hu, Wu = (upsize, upsize) if isinstance(upsize, int) else tuple(upsize)
    S, Sd, Su = H * W, Hd * Wd, Hu * Wu

    # Separable 1-D operators, combined per axis-pair (host-side, data independent).
    ph = _avgpool_matrix(H, downsize)          # [Hd, H]
    pw = _avgpool_matrix(W, downsize)          # [Wd, W]
    ah = _bilinear_matrix(Hu, Hd)              # [Hu, Hd]
    aw = _bilinear_matrix(Wu, Wd)              # [Wu, Wd]
    pt = jnp.asarray(np.kron(ph, pw).T)        # [S,  Sd]
    ut = jnp.asarray(np.kron(ah, aw).T)        # [Sd, Su]

    # Free reshapes only -- no transposes: NCHW kept end-to-end, batch folded into rows.
    x2 = x_nchw.reshape(N * Cin, S).astype(jnp.float32)                       # [N*Cin, S]
    w2 = conv_w.reshape(Cout, Cin).astype(jnp.float32)                        # [Cout, Cin]
    w_blk = jnp.kron(jnp.eye(N, dtype=jnp.float32), w2)                       # [N*Cout, N*Cin]
    gb = jnp.concatenate(
        [gamma.reshape(Cout, 1), beta.reshape(Cout, 1)], axis=1
    ).astype(jnp.float32)                                                     # [Cout, 2]

    cost = pl.CostEstimate(
        flops=int(2 * (N * Cin * S * Sd + (N * Cout) * (N * Cin) * Sd + N * Cout * Sd * Su)
                  + 8 * N * Cout * Sd),
        transcendentals=int(Cout),
        bytes_accessed=int(4 * (N * Cin * S + S * Sd + (N * Cout) * (N * Cin)
                                + 2 * Cout + Sd * Su + N * Cout * Su)),
    )

    # Single fused, grid-less invocation: every operand lives fully in VMEM.
    out_flat = pl.pallas_call(
        _psp_fused_kernel,
        out_shape=jax.ShapeDtypeStruct((N * Cout, Su), jnp.float32),
        compiler_params=pltpu.CompilerParams(vmem_limit_bytes=_VMEM_LIMIT_BYTES),
        cost_estimate=cost,
    )(x2, pt, w_blk, gb, ut)

    return out_flat.reshape(N, Cout, Hu, Wu)   # free reshape; already NCHW


# ----------------------------------------------------------------------------- reference
def psp_decoder_reference(x_nchw, conv_w, gamma, beta, downsize, upsize):
    """Pure-JAX reference (NCHW, mirrors the PyTorch module semantics)."""
    N, Cin, H, W = x_nchw.shape
    Cout = conv_w.shape[0]
    Hd, Wd = H // downsize, W // downsize
    Hu, Wu = (upsize, upsize) if isinstance(upsize, int) else tuple(upsize)
    x = x_nchw.astype(jnp.float32)
    xp = x.reshape(N, Cin, Hd, downsize, Wd, downsize).mean(axis=(3, 5))    # AvgPool2d
    y = jnp.einsum('oc,nchw->nohw', conv_w.reshape(Cout, Cin).astype(jnp.float32), xp)
    mean = y.mean(axis=(0, 2, 3), keepdims=True)                            # BN (train)
    var = ((y - mean) ** 2).mean(axis=(0, 2, 3), keepdims=True)
    y = (y - mean) * jax.lax.rsqrt(var + BN_EPS)
    y = y * gamma.reshape(1, Cout, 1, 1) + beta.reshape(1, Cout, 1, 1)
    y = jnp.maximum(y, 0.0)                                                 # ReLU
    Ah = jnp.asarray(_bilinear_matrix(Hu, Hd))
    Aw = jnp.asarray(_bilinear_matrix(Wu, Wd))
    out = jnp.einsum('ip,ncpq->nciq', Ah, y)                                # Upsample H
    out = jnp.einsum('jq,nciq->ncij', Aw, out)                              # Upsample W
    return out


if __name__ == "__main__":
    # PSPDecoder(in_features=4, out_features=8, downsize=4, upsize=16)
    N, Cin, H, W = 2, 4, 16, 16
    Cout, downsize, upsize = 8, 4, 16

    key = jax.random.PRNGKey(0)
    k1, k2, k3, k4 = jax.random.split(key, 4)
    x = jax.random.normal(k1, (N, Cin, H, W), dtype=jnp.float32)
    conv_w = jax.random.normal(k2, (Cout, Cin, 1, 1), dtype=jnp.float32) * 0.1
    gamma = 1.0 + 0.1 * jax.random.normal(k3, (Cout,), dtype=jnp.float32)
    beta = 0.1 * jax.random.normal(k4, (Cout,), dtype=jnp.float32)

    out = jax.block_until_ready(psp_decoder_forward(x, conv_w, gamma, beta, downsize, upsize))
    ref = jax.block_until_ready(psp_decoder_reference(x, conv_w, gamma, beta, downsize, upsize))

    assert out.shape == (N, Cout, upsize, upsize), out.shape
    if not jnp.allclose(out, ref, rtol=2e-3, atol=2e-3):
        raise AssertionError(f"mismatch, max abs diff = {jnp.max(jnp.abs(out - ref))}")
    print("KERNEL_OK")
</pallas_src>

<mosaic_0001>
module attributes {stable_mosaic.version = 11 : i64} {
  func.func @_psp_fused_kernel(%arg0: memref<8x256xf32, #tpu.memory_space<vmem>>, %arg1: memref<256x16xf32, #tpu.memory_space<vmem>>, %arg2: memref<16x8xf32, #tpu.memory_space<vmem>>, %arg3: memref<8x2xf32, #tpu.memory_space<vmem>>, %arg4: memref<16x256xf32, #tpu.memory_space<vmem>>, %arg5: memref<16x256xf32, #tpu.memory_space<vmem>>) attributes {dimension_semantics = [], scalar_prefetch = 0 : i64, scratch_operands = 0 : i64, tpu.core_type = #tpu.core_type<tc>} {
    %c0 = arith.constant 0 : index
    %c0_0 = arith.constant 0 : index
    %0 = vector.load %arg0[%c0, %c0_0] : memref<8x256xf32, #tpu.memory_space<vmem>>, vector<8x256xf32>
    %c0_1 = arith.constant 0 : index
    %c0_2 = arith.constant 0 : index
    %1 = vector.load %arg1[%c0_1, %c0_2] : memref<256x16xf32, #tpu.memory_space<vmem>>, vector<256x16xf32>
    %cst = arith.constant dense<0.000000e+00> : vector<8x16xf32>
    %2 = tpu.matmul %0, %1, %cst {dimension_numbers = #tpu.dot_dimension_numbers<[1], [0], [0], [1], [0, 0, 1, 1], [], []>} : vector<8x256xf32>, vector<256x16xf32>, vector<8x16xf32> -> vector<8x16xf32>
    %c0_3 = arith.constant 0 : index
    %c0_4 = arith.constant 0 : index
    %3 = vector.load %arg2[%c0_3, %c0_4] : memref<16x8xf32, #tpu.memory_space<vmem>>, vector<16x8xf32>
    %cst_5 = arith.constant dense<0.000000e+00> : vector<16x16xf32>
    %4 = tpu.matmul %3, %2, %cst_5 {dimension_numbers = #tpu.dot_dimension_numbers<[1], [0], [0], [1], [0, 0, 1, 1], [], []>} : vector<16x8xf32>, vector<8x16xf32>, vector<16x16xf32> -> vector<16x16xf32>
    %5 = vector.shape_cast %4 : vector<16x16xf32> to vector<2x8x16xf32>
    %cst_6 = arith.constant dense<0.000000e+00> : vector<2x8xf32>
    %6 = vector.multi_reduction <add>, %5, %cst_6 [2] : vector<2x8x16xf32> to vector<2x8xf32>
    %7 = vector.shape_cast %6 : vector<2x8xf32> to vector<2x8x1xf32>
    %cst_7 = arith.constant dense<0.000000e+00> : vector<8x1xf32>
    %8 = vector.multi_reduction <add>, %7, %cst_7 [0] : vector<2x8x1xf32> to vector<8x1xf32>
    %cst_8 = arith.constant 3.125000e-02 : f32
    %9 = vector.broadcast %cst_8 : f32 to vector<8x1xf32>
    %10 = arith.mulf %8, %9 : vector<8x1xf32>
    %11 = vector.shape_cast %10 : vector<8x1xf32> to vector<1x8x1xf32>
    %12 = vector.broadcast %11 : vector<1x8x1xf32> to vector<2x8x16xf32>
    %13 = arith.subf %5, %12 : vector<2x8x16xf32>
    %14 = arith.mulf %13, %13 : vector<2x8x16xf32>
    %cst_9 = arith.constant dense<0.000000e+00> : vector<2x8xf32>
    %15 = vector.multi_reduction <add>, %14, %cst_9 [2] : vector<2x8x16xf32> to vector<2x8xf32>
    %16 = vector.shape_cast %15 : vector<2x8xf32> to vector<2x8x1xf32>
    %cst_10 = arith.constant dense<0.000000e+00> : vector<8x1xf32>
    %17 = vector.multi_reduction <add>, %16, %cst_10 [0] : vector<2x8x1xf32> to vector<8x1xf32>
    %cst_11 = arith.constant 3.125000e-02 : f32
    %18 = vector.broadcast %cst_11 : f32 to vector<8x1xf32>
    %19 = arith.mulf %17, %18 : vector<8x1xf32>
    %c0_12 = arith.constant 0 : index
    %c0_13 = arith.constant 0 : index
    %20 = vector.load %arg3[%c0_12, %c0_13] : memref<8x2xf32, #tpu.memory_space<vmem>>, vector<8x1xf32>
    %c0_14 = arith.constant 0 : index
    %c1 = arith.constant 1 : index
    %21 = vector.load %arg3[%c0_14, %c1] : memref<8x2xf32, #tpu.memory_space<vmem>>, vector<8x1xf32>
    %cst_15 = arith.constant 9.99999974E-6 : f32
    %22 = vector.broadcast %cst_15 : f32 to vector<8x1xf32>
    %23 = arith.addf %19, %22 : vector<8x1xf32>
    %24 = math.rsqrt %23 : vector<8x1xf32>
    %25 = arith.mulf %20, %24 : vector<8x1xf32>
    %26 = vector.shape_cast %25 : vector<8x1xf32> to vector<1x8x1xf32>
    %27 = vector.broadcast %26 : vector<1x8x1xf32> to vector<2x8x16xf32>
    %28 = arith.mulf %13, %27 : vector<2x8x16xf32>
    %29 = vector.shape_cast %21 : vector<8x1xf32> to vector<1x8x1xf32>
    %30 = vector.broadcast %29 : vector<1x8x1xf32> to vector<2x8x16xf32>
    %31 = arith.addf %28, %30 : vector<2x8x16xf32>
    %cst_16 = arith.constant 0.000000e+00 : f32
    %32 = vector.broadcast %cst_16 : f32 to vector<2x8x16xf32>
    %33 = arith.maximumf %31, %32 : vector<2x8x16xf32>
    %34 = vector.shape_cast %33 : vector<2x8x16xf32> to vector<16x16xf32>
    %c0_17 = arith.constant 0 : index
    %c0_18 = arith.constant 0 : index
    %35 = vector.load %arg4[%c0_17, %c0_18] : memref<16x256xf32, #tpu.memory_space<vmem>>, vector<16x256xf32>
    %cst_19 = arith.constant dense<0.000000e+00> : vector<16x256xf32>
    %36 = tpu.matmul %34, %35, %cst_19 {dimension_numbers = #tpu.dot_dimension_numbers<[1], [0], [0], [1], [0, 0, 1, 1], [], []>} : vector<16x16xf32>, vector<16x256xf32>, vector<16x256xf32> -> vector<16x256xf32>
    %c0_20 = arith.constant 0 : index
    %c0_21 = arith.constant 0 : index
    %37 = vector.load %arg5[%c0_20, %c0_21] : memref<16x256xf32, #tpu.memory_space<vmem>>, vector<16x256xf32>
    tpu.vector_store %arg5[%c0_20, %c0_21], %36 {strides = array<i32>} : memref<16x256xf32, #tpu.memory_space<vmem>>, vector<16x256xf32>,
    return
  }
}

</mosaic_0001>

<bundles_post_ra>
// kernel: tpu_custom_call.1
= control target key start
LH: loop header
LB: loop body
LE: loop exit
PB: predicated region body
PF: predicated region fallthrough
CT: control target
= control target key end

     0   :  { %s605_s0 = inlined_call_operand.vmem [shape: f32[8,256], index: 0, kind: input, shape index: {}]   ;;  %s606_s1 = inlined_call_operand.vmem [shape: f32[256,16], index: 1, kind: input, shape index: {}]   ;;  %s607_s2 = inlined_call_operand.vmem [shape: f32[16,8], index: 2, kind: input, shape index: {}]   ;;  %s608_s3 = inlined_call_operand.vmem [shape: f32[8,2], index: 3, kind: input, shape index: {}]   ;;  %s609_s4 = inlined_call_operand.vmem [shape: f32[16,256], index: 4, kind: input, shape index: {}]   ;;  %s610_s5 = inlined_call_operand.hbm [shape: f32[16,256], index: 5, kind: output, shape index: {}]  }
   0x1   :  { %v54_v0 = vld [vmem:[%s606_s1 + $0xf8] sm:$0xff]  ;;  %v53_v2 = vld [vmem:[%s606_s1 + $0xf0] sm:$0xff]  ;;  %v52_v4 = vld [vmem:[%s606_s1 + $0xe8] sm:$0xff] }
   0x2   :  { %v38_v1 = vld [vmem:[%s606_s1 + $0x78] sm:$0xff]  ;;  %361 = vmatprep.subr.mxu0 %v54_v0  ;;  %v37_v3 = vld [vmem:[%s606_s1 + $0x70] sm:$0xff]  ;;  %v36_v5 = vld [vmem:[%s606_s1 + $0x68] sm:$0xff] }
   0x3   :  { %362 = vmatpush3.msra.mxu0 %v38_v1  ;;  %v51_v6 = vld [vmem:[%s606_s1 + $0xe0] sm:$0xff]  ;;  %v50_v8 = vld [vmem:[%s606_s1 + $0xd8] sm:$0xff]  ;;  %v49_v10 = vld [vmem:[%s606_s1 + $0xd0] sm:$0xff] }
   0x4   :  { %363 = vmatprep.subr.mxu0 %v53_v2  ;;  %v35_v7 = vld [vmem:[%s606_s1 + $0x60] sm:$0xff]  ;;  %v34_v9 = vld [vmem:[%s606_s1 + $0x58] sm:$0xff]  ;;  %v33_v11 = vld [vmem:[%s606_s1 + $0x50] sm:$0xff] }
   0x5   :  { %364 = vmatpush3.msra.mxu0 %v37_v3  ;;  %v48_v12 = vld [vmem:[%s606_s1 + $0xc8] sm:$0xff] }
   0x6   :  { %365 = vmatprep.subr.mxu0 %v52_v4  ;;  %v22_v13 = vld [vmem:[%s605_s0 + $0x8] sm:$0xff] }
   0x7   :  { %366 = vmatpush3.msra.mxu0 %v36_v5  ;;  %v32_v14 = vld [vmem:[%s606_s1 + $0x48] sm:$0xff]  ;;  %119 = vmatprep.mubr.f32.mxu0 %v22_v13 }
   0x8   :  { %367 = vmatprep.subr.mxu0 %v51_v6 }
   0x9   :  { %368 = vmatpush3.msra.mxu0 %v35_v7 }
   0xa   :  { %369 = vmatprep.subr.mxu0 %v50_v8 }
   0xb   :  { %370 = vmatpush3.msra.mxu0 %v34_v9 }
   0xc   :  { %371 = vmatprep.subr.mxu0 %v49_v10 }
   0xd   :  { %10 = vsyncpa [#allocation3], 0  ;;  %372 = vmatpush3.msra.mxu0 %v33_v11  ;;  %v47_v15 = vld [vmem:[%s606_s1 + $0xc0] sm:$0xff]  ;;  %v46_v17 = vld [vmem:[%s606_s1 + $0xb8] sm:$0xff]  ;;  %vm127_vm0 = vcmask 64512   ;;  %vm209_vm1 = vcmask 130048  }
   0xe   :  { %373 = vmatprep.subr.mxu0 %v48_v12  ;;  %v31_v16 = vld [vmem:[%s606_s1 + $0x40] sm:$0xff]  ;;  %v30_v18 = vld [vmem:[%s606_s1 + $0x38] sm:$0xff]  ;;  %v45_v19 = vld [vmem:[%s606_s1 + $0xb0] sm:$0xff]  ;;  %v437_v53 = vmov 0   ;;  %v438_v55 = vmov 1   ;;  %v439_v3 = vmov 0.0  }
   0xf   :  { %374 = vmatpush3.msra.mxu0 %v32_v14  ;;  %v29_v20 = vld [vmem:[%s606_s1 + $0x30] sm:$0xff]  ;;  %v44_v21 = vld [vmem:[%s606_s1 + $0xa8] sm:$0xff]  ;;  %v43_v23 = vld [vmem:[%s606_s1 + $0xa0] sm:$0xff]  ;;  %410 = vset.pattern.permute.xlu0 %v437_v53 }
  0x10   :  { %375 = vmatprep.subr.mxu0 %v47_v15  ;;  %v28_v22 = vld [vmem:[%s606_s1 + $0x28] sm:$0xff]  ;;  %v27_v24 = vld [vmem:[%s606_s1 + $0x20] sm:$0xff]  ;;  %v42_v25 = vld [vmem:[%s606_s1 + $0x98] sm:$0xff]  ;;  %411 = vset.pattern.permute.xlu1 %v438_v55 }
  0x11   :  { %376 = vmatpush3.msra.mxu0 %v31_v16  ;;  %v26_v26 = vld [vmem:[%s606_s1 + $0x18] sm:$0xff]  ;;  %v41_v27 = vld [vmem:[%s606_s1 + $0x90] sm:$0xff]  ;;  %v40_v29 = vld [vmem:[%s606_s1 + $0x88] sm:$0xff] }
  0x12   :  { %377 = vmatprep.subr.mxu0 %v46_v17  ;;  %v25_v28 = vld [vmem:[%s606_s1 + $0x10] sm:$0xff]  ;;  %v24_v30 = vld [vmem:[%s606_s1 + $0x8] sm:$0xff]  ;;  %v39_v31 = vld [vmem:[%s606_s1 + $0x80] sm:$0xff] }
  0x13   :  { %378 = vmatpush3.msra.mxu0 %v30_v18  ;;  %v23_v32 = vld [vmem:[%s606_s1] sm:$0xff]  ;;  %v126_v38 = vld [vmem:[%s607_s2 + $0x8] sm:$0xff]  ;;  %v253_v61 = vld [vmem:[%s609_s4 + $0x18] sm:$0xff] }
  0x14   :  { %379 = vmatprep.subr.mxu0 %v45_v19  ;;  %v21_v33 = vld [vmem:[%s605_s0] sm:$0xff]  ;;  %v252_v0 = vld [vmem:[%s609_s4 + $0x10] sm:$0xff]  ;;  %v251_v1 = vld [vmem:[%s609_s4 + $0x8] sm:$0xff] }
  0x15   :  { %380 = vmatpush3.msra.mxu0 %v29_v20  ;;  %v125_v34 = vld [vmem:[%s607_s2] sm:$0xff] }
  0x16   :  { %381 = vmatprep.subr.mxu0 %v44_v21  ;;  %401 = vmatprep.mubr.msk.f32.mxu1 %vm127_vm0, %v125_v34  ;;  %v230_v54 = vld [vmem:[%s608_s3] sm:$0xff] }
  0x17   :  { %382 = vmatpush3.msra.mxu0 %v28_v22  ;;  %v250_v2 = vld [vmem:[%s609_s4] sm:$0xff]  ;;  %s440_s4 = smov [#allocation2]  }
  0x18   :  { %383 = vmatprep.subr.mxu0 %v43_v23  ;;  %s346_s21 = sshll.u32 %s440_s4, 4  ;;  %s347_s21 = int_to_ptr.vmem [resolvable:$true] %s346_s21 }
  0x19   :  { %384 = vmatpush3.msra.mxu0 %v27_v24  ;;  %s415_s22 = scalar_lea.vmem %s347_s21, 512  ;;  %p420_p1 = scmp.lt.s32.totalorder %s347_s21, %s347_s21 }
  0x1a   :  { %385 = vmatprep.subr.mxu0 %v42_v25  ;;  %p416_p0 = scmp.ne.s32.totalorder %s347_s21, %s415_s22  ;;  %p421_p2 = scmp.lt.s32.totalorder %s415_s22, %s415_s22 }
  0x1b   :  { %386 = vmatpush3.msra.mxu0 %v26_v26 }
  0x1c   :  { %387 = vmatprep.subr.mxu0 %v41_v27  ;;  %p422_p3 = por %p421_p2, %p420_p1 }
  0x1d   :  { %388 = vmatpush3.msra.mxu0 %v25_v28 }
  0x1e   :  { %389 = vmatprep.subr.mxu0 %v40_v29  ;;  %p423_p4 = pnand %p422_p3, %p416_p0 }
  0x1f   :  { %390 = vmatpush3.msra.mxu0 %v24_v30 }
  0x20   :  { %391 = vmatprep.subr.mxu0 %v39_v31 }
  0x21   :  { %392 = vmatpush3.msra.mxu0 %v23_v32 }
  0x22   :  { %120 = vmatmul.mubr.f32.vlgmr.msra.gmra.mxu0 %v21_v33 }
  0xe2   :  { %v393_v35 = vpop.f32.mrf.mxu0 }
  0xe4   :  { %v394_v36 = vpop.f32.mrf.mxu0 }
  0xe5   :  { %v395_v37 = vadd.f32 %v394_v36, %v393_v35 }
  0xe7   :  { %399 = vmatprep.subr.mxu1 %v395_v37 }
  0xe8   :  { %400 = vmatpush3.msra.mxu1 %v395_v37 }
  0xe9   :  { %402 = vmatmul.mubr.msk.f32.vlgmr.msra.gmra.mxu1 %vm127_vm0, %v126_v38  ;;  %288 = vmatprep.subr.mxu1 %v253_v61 }
  0xea   :  { %289 = vmatpush1.msra.mxu1 %v252_v0  ;;  %324 = vmatprep.mubr.f32.mxu1 %v439_v3 }
  0xeb   :  { %290 = vmatprep.subr.mxu1 %v251_v1 }
  0xec   :  { %291 = vmatpush1.msra.mxu1 %v250_v2 }
 0x1a9   :  { %v403_v39 = vpop.f32.mrf.mxu1 }
 0x1aa   :  { %v213_v42 = vsel %vm209_vm1, %v403_v39, 0.0 }
 0x1ab   :  { %v200_v40 = vpop.f32.mrf.mxu1 }
 0x1ac   :  { %v210_v41 = vsel %vm209_vm1, %v200_v40, 0.0 }
 0x1ad   :  { %211 = vadd.xlane.f32.xlu0 %v210_v41 }
 0x1b1   :  { %214 = vadd.xlane.f32.xlu0 %v213_v42 }
 0x236   :  { %v212_v43 = vpop.xlane.xlu0 %211 }
 0x23a   :  { %v215_v44 = vpop.xlane.xlu0 %214 }
 0x23b   :  { %v216_v45 = vadd.f32 %v215_v44, %v212_v43 }
 0x23d   :  { %v217_v46 = vmul.f32 0.03125, %v216_v45 }
 0x23f   :  { %v218_v47 = vsub.f32 %v200_v40, %v217_v46  ;;  %v219_v48 = vsub.f32 %v403_v39, %v217_v46 }
 0x241   :  { %v220_v49 = vmul.f32 %v218_v47, %v218_v47  ;;  %v221_v51 = vmul.f32 %v219_v48, %v219_v48 }
 0x243   :  { %v222_v50 = vsel %vm209_vm1, %v220_v49, 0.0  ;;  %v225_v52 = vsel %vm209_vm1, %v221_v51, 0.0 }
 0x244   :  { %223 = vadd.xlane.f32.xlu1 %v222_v50 }
 0x248   :  { %226 = vadd.xlane.f32.xlu1 %v225_v52 }
 0x259   :  { %243 = vperm.xlu1 %411, %v230_v54  }
 0x2cd   :  { %v224_v56 = vpop.xlane.xlu1 %223 }
 0x2d1   :  { %v227_v57 = vpop.xlane.xlu1 %226 }
 0x2d2   :  { %v228_v58 = vadd.f32 %v227_v57, %v224_v56 }
 0x2d4   :  { %v229_v59 = vmul.f32 0.03125, %v228_v58 }
 0x2d5   :  { %v244_v5 = vpop.permute.xlu1 %243 }
 0x2d6   :  { %v231_v60 = vadd.f32 1e-05, %v229_v59 }
 0x2d8   :  { %413 = vrsqrt.f32 %v231_v60 }
 0x2e5   :  { %v414_v62 = vpop.eup %413 }
 0x2e6   :  { %v233_v63 = vmul.f32 %v414_v62, %v230_v54 }
 0x2e8   :  { %236 = vperm.xlu0 %410, %v233_v63  }
 0x2ec   :  { %412 = vset.pattern.permute.xlu0 %v438_v55 }
 0x363   :  { %v237_v4 = vpop.permute.xlu0 %236 }
 0x364   :  { %v239_v6 = vmul.f32 %v237_v4, %v218_v47  ;;  %v240_v7 = vmul.f32 %v237_v4, %v219_v48 }
 0x366   :  { %v246_v8 = vadd.f32 %v244_v5, %v239_v6  ;;  %v247_v9 = vadd.f32 %v244_v5, %v240_v7 }
 0x368   :  { %v248_v10 = vmax.f32 %v246_v8, 0.0  ;;  %v249_v11 = vmax.f32 %v247_v9, 0.0 }
 0x36a   :  { %359 = vmatmul.mubr.msk.f32.vlgmr.msra.gmra.mxu1 %vm209_vm1, %v248_v10 }
 0x36b   :  { %330 = vmatprep.mubr.f32.mxu1 %v439_v3 }
 0x36e   :  { %360 = vmatmul.mubr.msk.f32.gmra.mxu1 %vm209_vm1, %v249_v11 }
 0x42a   :  { %v326_v12 = vpop.f32.mrf.mxu1 }
 0x42b   :  { %337 = vst [vmem:[#allocation2] sm:$0xff] %v326_v12 }
 0x42c   :  { %v328_v13 = vpop.f32.mrf.mxu1 }
 0x42d   :  { %338 = vst [vmem:[#allocation2 + $0x8] sm:$0xff] %v328_v13 }
 0x42e   :  { %v332_v14 = vpop.f32.mrf.mxu1 }
 0x42f   :  { %339 = vst [vmem:[#allocation2 + $0x10] sm:$0xff] %v332_v14 }
 0x430   :  { %v334_v15 = vpop.f32.mrf.mxu1 }
 0x431   :  { %340 = vst [vmem:[#allocation2 + $0x18] sm:$0xff] %v334_v15 }
 0x432   :  { %426 = shalt.err (!%p423_p4)
}
 0x433   :  { %s441_s23 = smov 256   ;;  %s442_s24 = smov 16  }
 0x434   :  { %352 = dma.vmem_to_hbm [thread:$0]  %s347_s21, 512, %s610_s5, [#allocation3], %s441_s23, %s441_s23, %s442_s24  }
 0x435   :  { %435 = dma.done.wait [#allocation3], 512  }
 0x436   :  { %436 = vsyncadd [#allocation3], 4294966784 }
 0x437   :  { %356 = vsyncpa [#allocation3], 1 }

</bundles_post_ra>
